<compile_context>
chip_gen: v7x
topology: tpu7x:2x2x1
jax: 0.10.0
libtpu: 0.0.40
codegen_flags: <defaults>
</compile_context>

<pallas_src>
import functools
import math

import jax
import jax.numpy as jnp
from jax import lax
from jax.experimental import pallas as pl
from jax.experimental.pallas import tpu as pltpu


def _round_up(a, b):
    return (a + b - 1) // b * b


def _epilogue(y, b_ref, *, weight_gain, bias_gain, activation, act_gain,
              has_bias, out_dtype):
    """Shared f32 epilogue: scalar gains, bias, activation, cast."""
    if weight_gain != 1.0:
        y = y * weight_gain                 # scalar gain folded into f32 epilogue
    if has_bias:
        b = b_ref[...].astype(jnp.float32)
        if bias_gain != 1.0:
            b = b * bias_gain
        y = y + b
    if activation == 'linear':
        pass
    elif activation == 'relu':
        y = jnp.maximum(y, 0.0)
    elif activation == 'lrelu':
        y = jnp.where(y >= 0.0, y, 0.2 * y)
    else:
        # TODO(synk): other bias_act activations (tanh/sigmoid/elu/...) not wired up.
        raise NotImplementedError(activation)
    if act_gain != 1.0:
        y = y * act_gain
    return y.astype(out_dtype)


def _fc_kernel_single(*refs, weight_gain, bias_gain, activation, act_gain,
                      has_bias):
    """Full-K-in-one-block path: grid (M tiles, N tiles), no accumulator."""
    if has_bias:
        x_ref, w_ref, b_ref, o_ref = refs
    else:
        x_ref, w_ref, o_ref = refs
        b_ref = None

    # x: (tm, K), w: (tn, K) in PyTorch [out, in] layout -> contract on the
    # last axis of both; no physical transpose of the weight is materialized.
    y = lax.dot_general(
        x_ref[...], w_ref[...],
        dimension_numbers=(((1,), (1,)), ((), ())),
        preferred_element_type=jnp.float32)
    o_ref[...] = _epilogue(
        y, b_ref, weight_gain=weight_gain, bias_gain=bias_gain,
        activation=activation, act_gain=act_gain, has_bias=has_bias,
        out_dtype=o_ref.dtype)


def _fc_kernel_ktiled(*refs, weight_gain, bias_gain, activation, act_gain,
                      has_bias):
    """K-tiled path: grid (M tiles, N tiles, K tiles) with f32 accumulator."""
    if has_bias:
        x_ref, w_ref, b_ref, o_ref, acc_ref = refs
    else:
        x_ref, w_ref, o_ref, acc_ref = refs
        b_ref = None

    k = pl.program_id(2)

    @pl.when(k == 0)
    def _():
        acc_ref[...] = jnp.zeros_like(acc_ref)

    acc_ref[...] += lax.dot_general(
        x_ref[...], w_ref[...],
        dimension_numbers=(((1,), (1,)), ((), ())),
        preferred_element_type=jnp.float32)

    @pl.when(k == pl.num_programs(2) - 1)
    def _():
        o_ref[...] = _epilogue(
            acc_ref[...], b_ref, weight_gain=weight_gain, bias_gain=bias_gain,
            activation=activation, act_gain=act_gain, has_bias=has_bias,
            out_dtype=o_ref.dtype)


def fully_connected_layer(x, weight, bias=None, *, activation='linear',
                          lr_multiplier=1.0, tm=128, tn=128, tk_max=1024):
    """Pallas implementation of FullyConnectedLayer.forward.

    x: (M, K), weight: (N, K) (PyTorch layout), bias: (N,) or None.
    """
    M, K = x.shape
    N, Kw = weight.shape
    assert K == Kw

    weight_gain = float(lr_multiplier) / math.sqrt(K)
    bias_gain = float(lr_multiplier)
    # StyleGAN bias_act default gains.
    act_gain = 1.0 if activation == 'linear' else math.sqrt(2.0)
    has_bias = bias is not None

    if weight.dtype != x.dtype:
        weight = weight.astype(x.dtype)

    # ---- Tile sizes (lane-dense, (8,128)-aligned or full-dim blocks). ----
    tm = min(tm, _round_up(M, 8))
    tn = min(tn, _round_up(N, 128))
    if K <= tk_max:
        tk, K_p = K, K                      # full-K block (== array dim is legal)
        k_tiled = False
    else:
        tk = tk_max                         # multiple of 128
        K_p = _round_up(K, tk)
        k_tiled = True
    M_p = _round_up(M, tm)
    N_p = _round_up(N, tn)

    # ---- Zero-padding (exact for the matmul; padded rows/cols sliced off). ----
    if (M_p, K_p) != (M, K):
        x = jnp.pad(x, ((0, M_p - M), (0, K_p - K)))
    if (N_p, K_p) != (N, K):
        weight = jnp.pad(weight, ((0, N_p - N), (0, K_p - K)))

    args = [x, weight]
    kwargs = dict(weight_gain=weight_gain, bias_gain=bias_gain,
                  activation=activation, act_gain=act_gain, has_bias=has_bias)

    if k_tiled:
        in_specs = [
            pl.BlockSpec((tm, tk), lambda i, j, k: (i, k)),   # x tile
            pl.BlockSpec((tn, tk), lambda i, j, k: (j, k)),   # weight tile (N, K)
        ]
        bias_spec = pl.BlockSpec((1, tn), lambda i, j, k: (0, j))
        out_spec = pl.BlockSpec((tm, tn), lambda i, j, k: (i, j))
        grid = (M_p // tm, N_p // tn, K_p // tk)
        scratch = [pltpu.VMEM((tm, tn), jnp.float32)]
        kernel = functools.partial(_fc_kernel_ktiled, **kwargs)
        dims = ("parallel", "parallel", "arbitrary")
    else:
        in_specs = [
            pl.BlockSpec((tm, tk), lambda i, j: (i, 0)),      # x tile (full K)
            pl.BlockSpec((tn, tk), lambda i, j: (j, 0)),      # weight tile (full K)
        ]
        bias_spec = pl.BlockSpec((1, tn), lambda i, j: (0, j))
        out_spec = pl.BlockSpec((tm, tn), lambda i, j: (i, j))
        grid = (M_p // tm, N_p // tn)
        scratch = []
        kernel = functools.partial(_fc_kernel_single, **kwargs)
        dims = ("parallel", "parallel")

    if has_bias:
        b2d = bias.astype(x.dtype).reshape(1, N)
        if N_p != N:
            b2d = jnp.pad(b2d, ((0, 0), (0, N_p - N)))
        args.append(b2d)
        in_specs.append(bias_spec)

    out = pl.pallas_call(
        kernel,
        out_shape=jax.ShapeDtypeStruct((M_p, N_p), x.dtype),
        grid_spec=pltpu.PrefetchScalarGridSpec(
            num_scalar_prefetch=0,
            grid=grid,
            in_specs=in_specs,
            out_specs=out_spec,
            scratch_shapes=scratch,
        ),
        compiler_params=pltpu.CompilerParams(dimension_semantics=dims),
    )(*args)

    if (M_p, N_p) != (M, N):
        out = out[:M, :N]
    return out


def _reference(x, weight, bias, activation, lr_multiplier):
    K = x.shape[1]
    w = weight.astype(x.dtype) * (lr_multiplier / math.sqrt(K))
    y = x @ w.T
    if bias is not None:
        y = y + bias.astype(x.dtype) * lr_multiplier
    if activation == 'linear':
        return y
    if activation == 'relu':
        return jnp.maximum(y, 0.0) * math.sqrt(2.0)
    if activation == 'lrelu':
        return jnp.where(y >= 0.0, y, 0.2 * y) * math.sqrt(2.0)
    raise NotImplementedError(activation)


if __name__ == "__main__":
    key = jax.random.PRNGKey(0)
    kx, kw, kx2, kw2, kb2, kx3, kw3 = jax.random.split(key, 7)

    # ---- Case 1: module defaults (activation='linear', bias=True). ----
    batch, in_features, out_features = 8, 32, 64
    lr_multiplier, weight_init, bias_init = 1.0, 1.0, 0.0

    x = jax.random.normal(kx, (batch, in_features), dtype=jnp.float32)
    weight = jax.random.normal(kw, (out_features, in_features),
                               dtype=jnp.float32) * (weight_init / lr_multiplier)
    bias = jnp.broadcast_to(jnp.asarray(bias_init, dtype=jnp.float32),
                            (out_features,)) / lr_multiplier

    out = fully_connected_layer(x, weight, bias, activation='linear',
                                lr_multiplier=lr_multiplier)
    out = jax.block_until_ready(out)
    ref = _reference(x, weight, bias, 'linear', lr_multiplier)
    assert out.shape == (batch, out_features)
    assert jnp.allclose(out, ref, atol=1e-5, rtol=1e-5)

    # ---- Case 2: bias_act path with 'lrelu'. ----
    out2 = fully_connected_layer(x, weight, bias, activation='lrelu',
                                 lr_multiplier=lr_multiplier)
    out2 = jax.block_until_ready(out2)
    ref2 = _reference(x, weight, bias, 'lrelu', lr_multiplier)
    assert jnp.allclose(out2, ref2, atol=1e-5, rtol=1e-5)

    # ---- Case 3: ragged M/N, K-tiled path, no bias, lr_multiplier != 1. ----
    M2, K2, N2 = 20, 256, 192
    x2 = jax.random.normal(kx2, (M2, K2), dtype=jnp.float32)
    w2 = jax.random.normal(kw2, (N2, K2), dtype=jnp.float32)
    out3 = fully_connected_layer(x2, w2, None, activation='relu',
                                 lr_multiplier=0.01, tk_max=128)
    out3 = jax.block_until_ready(out3)
    ref3 = _reference(x2, w2, None, 'relu', 0.01)
    assert out3.shape == (M2, N2)
    assert jnp.allclose(out3, ref3, atol=1e-4, rtol=1e-5)

    # ---- Case 4: K-tiled path with bias (accumulator + epilogue bias). ----
    M3, K3, N3 = 16, 384, 128
    x3 = jax.random.normal(kx3, (M3, K3), dtype=jnp.float32)
    w3 = jax.random.normal(kw3, (N3, K3), dtype=jnp.float32)
    b3 = jax.random.normal(kb2, (N3,), dtype=jnp.float32)
    out4 = fully_connected_layer(x3, w3, b3, activation='lrelu',
                                 lr_multiplier=0.5, tk_max=128)
    out4 = jax.block_until_ready(out4)
    ref4 = _reference(x3, w3, b3, 'lrelu', 0.5)
    assert jnp.allclose(out4, ref4, atol=1e-4, rtol=1e-5)

    print("KERNEL_OK")
</pallas_src>

<mosaic_0001>
module attributes {stable_mosaic.version = 11 : i64} {
  func.func @_fc_kernel_single(%arg0: i32, %arg1: i32, %arg2: memref<8x32xf32, #tpu.memory_space<vmem>>, %arg3: memref<128x32xf32, #tpu.memory_space<vmem>>, %arg4: memref<1x128xf32, #tpu.memory_space<vmem>>, %arg5: memref<8x128xf32, #tpu.memory_space<vmem>>) attributes {dimension_semantics = [#tpu.dimension_semantics<parallel>, #tpu.dimension_semantics<parallel>], iteration_bounds = array<i64: 1, 1>, scalar_prefetch = 0 : i64, scratch_operands = 0 : i64, tpu.core_type = #tpu.core_type<tc>, window_params = [{transform_indices = @transform_0, window_bounds = array<i64: 8, 32>}, {transform_indices = @transform_1, window_bounds = array<i64: 128, 32>}, {transform_indices = @transform_2, window_bounds = array<i64: 1, 128>}, {transform_indices = @transform_3, window_bounds = array<i64: 8, 128>}]} {
    %c0 = arith.constant 0 : index
    %c0_0 = arith.constant 0 : index
    %0 = vector.load %arg2[%c0, %c0_0] : memref<8x32xf32, #tpu.memory_space<vmem>>, vector<8x32xf32>
    %c0_1 = arith.constant 0 : index
    %c0_2 = arith.constant 0 : index
    %1 = vector.load %arg3[%c0_1, %c0_2] : memref<128x32xf32, #tpu.memory_space<vmem>>, vector<128x32xf32>
    %cst = arith.constant dense<0.000000e+00> : vector<8x128xf32>
    %2 = tpu.matmul %0, %1, %cst {dimension_numbers = #tpu.dot_dimension_numbers<[1], [1], [0], [0], [0, 0, 1, 0], [], []>} : vector<8x32xf32>, vector<128x32xf32>, vector<8x128xf32> -> vector<8x128xf32>
    %cst_3 = arith.constant 0.176776692 : f32
    %3 = vector.broadcast %cst_3 : f32 to vector<8x128xf32>
    %4 = arith.mulf %2, %3 : vector<8x128xf32>
    %c0_4 = arith.constant 0 : index
    %c0_5 = arith.constant 0 : index
    %5 = vector.load %arg4[%c0_4, %c0_5] : memref<1x128xf32, #tpu.memory_space<vmem>>, vector<1x128xf32>
    %6 = vector.broadcast %5 : vector<1x128xf32> to vector<8x128xf32>
    %7 = arith.addf %4, %6 : vector<8x128xf32>
    %c0_6 = arith.constant 0 : index
    %c0_7 = arith.constant 0 : index
    %8 = vector.load %arg5[%c0_6, %c0_7] : memref<8x128xf32, #tpu.memory_space<vmem>>, vector<8x128xf32>
    tpu.vector_store %arg5[%c0_6, %c0_7], %7 {strides = array<i32>} : memref<8x128xf32, #tpu.memory_space<vmem>>, vector<8x128xf32>,
    return
  }
  func.func @transform_0(%arg0: i32, %arg1: i32) -> (i32, i32) {
    %c0_i32 = arith.constant 0 : i32
    %c0_i32_0 = arith.constant 0 : i32
    return %arg0, %c0_i32 : i32, i32
  }
  func.func @transform_1(%arg0: i32, %arg1: i32) -> (i32, i32) {
    %c0_i32 = arith.constant 0 : i32
    %c0_i32_0 = arith.constant 0 : i32
    return %arg1, %c0_i32 : i32, i32
  }
  func.func @transform_2(%arg0: i32, %arg1: i32) -> (i32, i32) {
    %c0_i32 = arith.constant 0 : i32
    %c0_i32_0 = arith.constant 0 : i32
    return %c0_i32, %arg1 : i32, i32
  }
  func.func @transform_3(%arg0: i32, %arg1: i32) -> (i32, i32) {
    %c0_i32 = arith.constant 0 : i32
    return %arg0, %arg1 : i32, i32
  }
}

</mosaic_0001>

<bundles_post_ra>
// kernel: tpu_custom_call.1
= control target key start
LH: loop header
LB: loop body
LE: loop exit
PB: predicated region body
PF: predicated region fallthrough
CT: control target
= control target key end

     0   :  { %vm32_vm0 = vcmask 261120   ;;  %v308_v2 = vmov 0.0|0.0   ;;  %vm309_vm2 = vmmov 0   ;;  %v310_v5 = vmov 0.0   ;;  %s421_s0 = inlined_call_operand.vmem [shape: f32[8,32], index: 0, kind: input, shape index: {}]   ;;  %s422_s1 = inlined_call_operand.vmem [shape: f32[128,32], index: 1, kind: input, shape index: {}]   ;;  %s423_s2 = inlined_call_operand.vmem [shape: f32[1,128], index: 2, kind: input, shape index: {}]   ;;  %s424_s3 = inlined_call_operand.hbm [shape: f32[8,128], index: 3, kind: output, shape index: {}]  }
   0x1   :  { %v16_v0 = vld [vmem:[%s422_s1] sm:$0xff]  ;;  %v17_v1 = vld [vmem:[%s422_s1 + $0x8] sm:$0xff]  ;;  %248 = vmatprep.subr.bf16.mxu0 %v308_v2  ;;  %vm340_vm1 = vmpackc.low %vm32_vm0, %vm32_vm0  ;;  %245 = vmatprep.mubr.msk.f32.mxu0 %vm309_vm2, %v310_v5 }
   0x2   :  { %v249_v3 = vpack.c.bf16 %v17_v1, %v16_v0  ;;  %v18_v6 = vld [vmem:[%s422_s1 + $0x10] sm:$0xff]  ;;  %v19_v7 = vld [vmem:[%s422_s1 + $0x18] sm:$0xff] }
   0x4   :  { %251 = vmatpush3.bf16.xpose.msk.msra.mxu0 %vm340_vm1, %v249_v3 }
   0x5   :  { %252 = vmatprep.subr.bf16.mxu0 %v308_v2 }
   0x6   :  { %8 = vsyncpa [#allocation3], 0  ;;  %v253_v8 = vpack.c.bf16 %v19_v7, %v18_v6  ;;  %v20_v9 = vld [vmem:[%s422_s1 + $0x20] sm:$0xff]  ;;  %v21_v10 = vld [vmem:[%s422_s1 + $0x28] sm:$0xff]  ;;  %s311_s21 = smov [#allocation2]  }
   0x7   :  { %v257_v11 = vpack.c.bf16 %v21_v10, %v20_v9  ;;  %v22_v12 = vld [vmem:[%s422_s1 + $0x30] sm:$0xff]  ;;  %v23_v13 = vld [vmem:[%s422_s1 + $0x38] sm:$0xff]  ;;  %v24_v15 = vld [vmem:[%s422_s1 + $0x40] sm:$0xff]  ;;  %s170_s22 = sshll.u32 %s311_s21, 4  ;;  %s171_s22 = int_to_ptr.vmem [resolvable:$true] %s170_s22 }
   0x8   :  { %v261_v14 = vpack.c.bf16 %v23_v13, %v22_v12  ;;  %v25_v16 = vld [vmem:[%s422_s1 + $0x48] sm:$0xff]  ;;  %v26_v18 = vld [vmem:[%s422_s1 + $0x50] sm:$0xff]  ;;  %v27_v19 = vld [vmem:[%s422_s1 + $0x58] sm:$0xff]  ;;  %p289_p1 = scmp.lt.s32.totalorder %s171_s22, %s171_s22 }
   0x9   :  { %v265_v17 = vpack.c.bf16 %v25_v16, %v24_v15  ;;  %v269_v20 = vpack.c.bf16 %v27_v19, %v26_v18  ;;  %v28_v21 = vld [vmem:[%s422_s1 + $0x60] sm:$0xff]  ;;  %v29_v22 = vld [vmem:[%s422_s1 + $0x68] sm:$0xff]  ;;  %v30_v24 = vld [vmem:[%s422_s1 + $0x70] sm:$0xff] }
   0xa   :  { %v273_v23 = vpack.c.bf16 %v29_v22, %v28_v21  ;;  %v31_v25 = vld [vmem:[%s422_s1 + $0x78] sm:$0xff]  ;;  %v15_v27 = vld [vmem:[%s421_s0] sm:$0xff]  ;;  %s284_s1 = scalar_lea.vmem %s171_s22, 128 }
   0xb   :  { %v277_v26 = vpack.c.bf16 %v31_v25, %v30_v24  ;;  %v195_v29 = vld [vmem:[%s423_s2] ss:$0 sm:$0xff]  ;;  %p285_p0 = scmp.ne.s32.totalorder %s171_s22, %s284_s1  ;;  %p290_p2 = scmp.lt.s32.totalorder %s284_s1, %s284_s1 }
   0xc   :  { %255 = vmatpush3.bf16.xpose.msk.msra.mxu0 %vm340_vm1, %v253_v8 }
   0xd   :  { %256 = vmatprep.subr.bf16.mxu0 %v308_v2  ;;  %p291_p3 = por %p290_p2, %p289_p1 }
   0xf   :  { %p292_p4 = pnand %p291_p3, %p285_p0 }
  0x14   :  { %259 = vmatpush3.bf16.xpose.msk.msra.mxu0 %vm340_vm1, %v257_v11 }
  0x15   :  { %260 = vmatprep.subr.bf16.mxu0 %v308_v2 }
  0x1c   :  { %263 = vmatpush3.bf16.xpose.msk.msra.mxu0 %vm340_vm1, %v261_v14 }
  0x1d   :  { %264 = vmatprep.subr.bf16.mxu0 %v308_v2 }
  0x24   :  { %267 = vmatpush3.bf16.xpose.msk.msra.mxu0 %vm340_vm1, %v265_v17 }
  0x25   :  { %268 = vmatprep.subr.bf16.mxu0 %v308_v2 }
  0x2c   :  { %271 = vmatpush3.bf16.xpose.msk.msra.mxu0 %vm340_vm1, %v269_v20 }
  0x2d   :  { %272 = vmatprep.subr.bf16.mxu0 %v308_v2 }
  0x34   :  { %275 = vmatpush3.bf16.xpose.msk.msra.mxu0 %vm340_vm1, %v273_v23 }
  0x35   :  { %276 = vmatprep.subr.bf16.mxu0 %v308_v2 }
  0x3c   :  { %279 = vmatpush3.bf16.xpose.msk.msra.mxu0 %vm340_vm1, %v277_v26 }
  0x43   :  { %246 = vmatmul.mubr.msk.f32.vlgmr.msra.gmra.mrb[0].mxu0 %vm32_vm0, %v15_v27 }
 0x116   :  { %v150_v28 = vpop.f32.mrb[0].mxu0 }
 0x117   :  { %v154_v30 = vmul.f32 0.17677669, %v150_v28  ;;  %v247_v31 = vpop.f32.mrb[1].mxu0 }
 0x119   :  { %v162_v32 = vadd.f32 %v195_v29, %v154_v30 }
 0x11b   :  { %163 = vst [vmem:[#allocation2] sm:$0xff] %v162_v32 }
 0x11c   :  { %295 = shalt.err (!%p292_p4)
}
 0x11d   :  { %s296_s24 = scalar_lea.hbm %s424_s3, 128 }
 0x11e   :  { %p297_p5 = scmp.ne.s32.totalorder %s424_s3, %s296_s24  ;;  %p300_p6 = scmp.lt.u32.totalorder %s296_s24, %s424_s3 }
 0x120   :  { %p302_p7 = pnand %p300_p6, %p297_p5 }
 0x122   :  { %305 = shalt.err (!%p302_p7)
}
 0x123   :  { %173 = dma.vmem_to_hbm [thread:$0]  %s171_s22, 128, %s424_s3, [#allocation3]  }
 0x124   :  { %306 = dma.done.wait [#allocation3], 128  }
 0x125   :  { %307 = vsyncadd [#allocation3], 4294967168 }
 0x126   :  { %177 = vsyncpa [#allocation3], 1 }

</bundles_post_ra>
